<compile_context>
chip_gen: v5e
topology: v5e:2x2
jax: 0.10.0
libtpu: 0.0.40
codegen_flags: <defaults>
</compile_context>

<pallas_src>
import math
import jax
import jax.numpy as jnp
from jax.experimental import pallas as pl
from jax.experimental.pallas import tpu as pltpu

LANE = 128            # vreg lane width
MAX_TILE_ROWS = 4096  # (4096, 128) f32 tile = 2 MiB; x2 arrays x2 buffers = 8 MiB VMEM


def _round_up(a, b):
    return (a + b - 1) // b * b


def mlp_kernel(params_ref, x_ref, o_ref):
    # params_ref: SMEM f32[10] =
    #   [w1_0, w1_1, w1_2, b1_0, b1_1, b1_2, 0.5*w2_0, 0.5*w2_1, 0.5*w2_2, 0.5*b2]
    # x_ref / o_ref: (TR, 128) f32 lane-dense batch slab tiles.
    x = x_ref[...]

    w1_0 = params_ref[0]
    w1_1 = params_ref[1]
    w1_2 = params_ref[2]
    b1_0 = params_ref[3]
    b1_1 = params_ref[4]
    b1_2 = params_ref[5]
    w2h_0 = params_ref[6]   # 0.5 * w2[0]
    w2h_1 = params_ref[7]   # 0.5 * w2[1]
    w2h_2 = params_ref[8]   # 0.5 * w2[2]
    b2h = params_ref[9]     # 0.5 * b2

    # layer1 + ReLU, hidden dim unrolled (pure VPU elementwise).
    h0 = jnp.maximum(w1_0 * x + b1_0, 0.0)
    h1 = jnp.maximum(w1_1 * x + b1_1, 0.0)
    h2 = jnp.maximum(w1_2 * x + b1_2, 0.0)

    # layer2 (dot over hidden dim of 3, unrolled), pre-scaled by 0.5 host-side: zh = 0.5*z.
    zh = w2h_0 * h0 + w2h_1 * h1 + w2h_2 * h2 + b2h

    # Exact sigmoid: sigmoid(z) = 0.5*tanh(z/2) + 0.5 (single EUP tanh, no approx reciprocal).
    o_ref[...] = 0.5 * jnp.tanh(zh) + 0.5


def mlp_forward(x, w1, b1, w2, b2, *, max_rows_per_tile=MAX_TILE_ROWS):
    """x: (B, 1); w1: (3, 1); b1: (3,); w2: (1, 3); b2: (1,)  -> (B, 1) float32."""
    B = x.shape[0]

    # ---- lane-dense batch slab: (rows_padded, 128) with balanced, divisible tiling ----
    rows = max(1, pl.cdiv(B, LANE))                       # 128-wide rows needed
    nt = pl.cdiv(rows, max_rows_per_tile)                 # grid steps
    TR = _round_up(pl.cdiv(rows, nt), 8)                  # row tile, multiple of 8, <= max
    rows_padded = nt * TR                                 # waste <= 8*nt rows
    total = rows_padded * LANE

    flat = x.reshape(-1).astype(jnp.float32)
    pad = total - B
    if pad:
        flat = jnp.concatenate([flat, jnp.zeros((pad,), jnp.float32)])
    x_slab = flat.reshape(rows_padded, LANE)

    # ---- all weights/biases as one small SMEM scalar array (0.5 folded into layer 2) ----
    params = jnp.concatenate(
        [
            w1.reshape(-1).astype(jnp.float32),           # 3
            b1.reshape(-1).astype(jnp.float32),           # 3
            0.5 * w2.reshape(-1).astype(jnp.float32),     # 3
            0.5 * b2.reshape(-1).astype(jnp.float32),     # 1
        ]
    )  # (10,) f32

    out_slab = pl.pallas_call(
        mlp_kernel,
        out_shape=jax.ShapeDtypeStruct((rows_padded, LANE), jnp.float32),
        grid=(nt,),
        in_specs=[
            pl.BlockSpec(memory_space=pltpu.MemorySpace.SMEM),   # scalar params, untiled
            pl.BlockSpec((TR, LANE), lambda i: (i, 0)),          # batch tile
        ],
        out_specs=pl.BlockSpec((TR, LANE), lambda i: (i, 0)),
        compiler_params=pltpu.CompilerParams(
            dimension_semantics=("parallel",),                   # shard batch grid over TCs
        ),
    )(params, x_slab)

    # Slice away padding and restore the (B, 1) layout of nn.Linear outputs.
    if total == B:
        return out_slab.reshape(B, 1)
    return out_slab.reshape(-1)[:B].reshape(B, 1)


def init_params(key):
    """Deterministic init mimicking PyTorch nn.Linear default U(-1/sqrt(fan_in), 1/sqrt(fan_in))."""
    k1, k2, k3, k4 = jax.random.split(key, 4)
    bound1 = 1.0 / math.sqrt(1.0)   # layer1: fan_in = 1
    bound2 = 1.0 / math.sqrt(3.0)   # layer2: fan_in = 3
    w1 = jax.random.uniform(k1, (3, 1), jnp.float32, -bound1, bound1)
    b1 = jax.random.uniform(k2, (3,), jnp.float32, -bound1, bound1)
    w2 = jax.random.uniform(k3, (1, 3), jnp.float32, -bound2, bound2)
    b2 = jax.random.uniform(k4, (1,), jnp.float32, -bound2, bound2)
    return w1, b1, w2, b2


def mlp_reference(x, w1, b1, w2, b2):
    h = jnp.maximum(x @ w1.T + b1, 0.0)
    z = h @ w2.T + b2
    return jax.nn.sigmoid(z)


if __name__ == "__main__":
    key = jax.random.PRNGKey(0)
    kx, kp, kx2, kx3 = jax.random.split(key, 4)
    w1, b1, w2, b2 = init_params(kp)

    ok = True

    # 1) Small batch (exercises the minimum 8x128 tile).
    B = 8
    x = jax.random.normal(kx, (B, 1), jnp.float32)
    out = jax.block_until_ready(mlp_forward(x, w1, b1, w2, b2))
    ref = mlp_reference(x, w1, b1, w2, b2)
    ok &= out.shape == (B, 1)
    ok &= bool(jnp.allclose(out, ref, atol=1e-5, rtol=1e-5))

    # 2) Non-multiple-of-128 batch (exercises the pad / slice-back path).
    B2 = 300
    x2 = jax.random.normal(kx2, (B2, 1), jnp.float32)
    out2 = jax.block_until_ready(mlp_forward(x2, w1, b1, w2, b2))
    ref2 = mlp_reference(x2, w1, b1, w2, b2)
    ok &= out2.shape == (B2, 1)
    ok &= bool(jnp.allclose(out2, ref2, atol=1e-5, rtol=1e-5))

    # 3) Multi-step grid (exercises the pipelined/tiled path with a small forced tile).
    B3 = 2000
    x3 = jax.random.normal(kx3, (B3, 1), jnp.float32)
    out3 = jax.block_until_ready(mlp_forward(x3, w1, b1, w2, b2, max_rows_per_tile=8))
    ref3 = mlp_reference(x3, w1, b1, w2, b2)
    ok &= out3.shape == (B3, 1)
    ok &= bool(jnp.allclose(out3, ref3, atol=1e-5, rtol=1e-5))

    assert ok
    print("KERNEL_OK")
</pallas_src>

<mosaic_0001>
module attributes {stable_mosaic.version = 11 : i64} {
  func.func @mlp_kernel(%arg0: i32, %arg1: memref<10xf32, #tpu.memory_space<smem>>, %arg2: memref<8x128xf32, #tpu.memory_space<vmem>>, %arg3: memref<8x128xf32, #tpu.memory_space<vmem>>) attributes {dimension_semantics = [#tpu.dimension_semantics<parallel>], iteration_bounds = array<i64: 1>, scalar_prefetch = 0 : i64, scratch_operands = 0 : i64, tpu.core_type = #tpu.core_type<tc>, window_params = [{transform_indices = @transform_0, window_bounds = array<i64: 10>}, {transform_indices = @transform_1, window_bounds = array<i64: 8, 128>}, {transform_indices = @transform_2, window_bounds = array<i64: 8, 128>}]} {
    %c0 = arith.constant 0 : index
    %c0_0 = arith.constant 0 : index
    %0 = vector.load %arg2[%c0, %c0_0] : memref<8x128xf32, #tpu.memory_space<vmem>>, vector<8x128xf32>
    %c0_1 = arith.constant 0 : index
    %1 = memref.load %arg1[%c0_1] : memref<10xf32, #tpu.memory_space<smem>>
    %c1 = arith.constant 1 : index
    %2 = memref.load %arg1[%c1] : memref<10xf32, #tpu.memory_space<smem>>
    %c2 = arith.constant 2 : index
    %3 = memref.load %arg1[%c2] : memref<10xf32, #tpu.memory_space<smem>>
    %c3 = arith.constant 3 : index
    %4 = memref.load %arg1[%c3] : memref<10xf32, #tpu.memory_space<smem>>
    %c4 = arith.constant 4 : index
    %5 = memref.load %arg1[%c4] : memref<10xf32, #tpu.memory_space<smem>>
    %c5 = arith.constant 5 : index
    %6 = memref.load %arg1[%c5] : memref<10xf32, #tpu.memory_space<smem>>
    %c6 = arith.constant 6 : index
    %7 = memref.load %arg1[%c6] : memref<10xf32, #tpu.memory_space<smem>>
    %c7 = arith.constant 7 : index
    %8 = memref.load %arg1[%c7] : memref<10xf32, #tpu.memory_space<smem>>
    %c8 = arith.constant 8 : index
    %9 = memref.load %arg1[%c8] : memref<10xf32, #tpu.memory_space<smem>>
    %c9 = arith.constant 9 : index
    %10 = memref.load %arg1[%c9] : memref<10xf32, #tpu.memory_space<smem>>
    %11 = vector.broadcast %1 : f32 to vector<8x128xf32>
    %12 = arith.mulf %11, %0 : vector<8x128xf32>
    %13 = vector.broadcast %4 : f32 to vector<8x128xf32>
    %14 = arith.addf %12, %13 : vector<8x128xf32>
    %cst = arith.constant 0.000000e+00 : f32
    %15 = vector.broadcast %cst : f32 to vector<8x128xf32>
    %16 = arith.maximumf %14, %15 : vector<8x128xf32>
    %17 = vector.broadcast %2 : f32 to vector<8x128xf32>
    %18 = arith.mulf %17, %0 : vector<8x128xf32>
    %19 = vector.broadcast %5 : f32 to vector<8x128xf32>
    %20 = arith.addf %18, %19 : vector<8x128xf32>
    %cst_2 = arith.constant 0.000000e+00 : f32
    %21 = vector.broadcast %cst_2 : f32 to vector<8x128xf32>
    %22 = arith.maximumf %20, %21 : vector<8x128xf32>
    %23 = vector.broadcast %3 : f32 to vector<8x128xf32>
    %24 = arith.mulf %23, %0 : vector<8x128xf32>
    %25 = vector.broadcast %6 : f32 to vector<8x128xf32>
    %26 = arith.addf %24, %25 : vector<8x128xf32>
    %cst_3 = arith.constant 0.000000e+00 : f32
    %27 = vector.broadcast %cst_3 : f32 to vector<8x128xf32>
    %28 = arith.maximumf %26, %27 : vector<8x128xf32>
    %29 = vector.broadcast %7 : f32 to vector<8x128xf32>
    %30 = arith.mulf %29, %16 : vector<8x128xf32>
    %31 = vector.broadcast %8 : f32 to vector<8x128xf32>
    %32 = arith.mulf %31, %22 : vector<8x128xf32>
    %33 = arith.addf %30, %32 : vector<8x128xf32>
    %34 = vector.broadcast %9 : f32 to vector<8x128xf32>
    %35 = arith.mulf %34, %28 : vector<8x128xf32>
    %36 = arith.addf %33, %35 : vector<8x128xf32>
    %37 = vector.broadcast %10 : f32 to vector<8x128xf32>
    %38 = arith.addf %36, %37 : vector<8x128xf32>
    %39 = math.tanh %38 : vector<8x128xf32>
    %cst_4 = arith.constant 5.000000e-01 : f32
    %40 = vector.broadcast %cst_4 : f32 to vector<8x128xf32>
    %41 = arith.mulf %40, %39 : vector<8x128xf32>
    %cst_5 = arith.constant 5.000000e-01 : f32
    %42 = vector.broadcast %cst_5 : f32 to vector<8x128xf32>
    %43 = arith.addf %41, %42 : vector<8x128xf32>
    %c0_6 = arith.constant 0 : index
    %c0_7 = arith.constant 0 : index
    %44 = vector.load %arg3[%c0_6, %c0_7] : memref<8x128xf32, #tpu.memory_space<vmem>>, vector<8x128xf32>
    tpu.vector_store %arg3[%c0_6, %c0_7], %43 {strides = array<i32>} : memref<8x128xf32, #tpu.memory_space<vmem>>, vector<8x128xf32>,
    return
  }
  func.func @transform_0(%arg0: i32) -> i32 {
    %c0_i32 = arith.constant 0 : i32
    %c0_i32_0 = arith.constant 0 : i32
    return %c0_i32 : i32
  }
  func.func @transform_1(%arg0: i32) -> (i32, i32) {
    %c0_i32 = arith.constant 0 : i32
    %c0_i32_0 = arith.constant 0 : i32
    return %arg0, %c0_i32 : i32, i32
  }
  func.func @transform_2(%arg0: i32) -> (i32, i32) {
    %c0_i32 = arith.constant 0 : i32
    %c0_i32_0 = arith.constant 0 : i32
    return %arg0, %c0_i32 : i32, i32
  }
}

</mosaic_0001>

<bundles_post_ra>
// kernel: tpu_custom_call.1
= control target key start
LH: loop header
LB: loop body
LE: loop exit
PB: predicated region body
PF: predicated region fallthrough
CT: control target
= control target key end

     0   :  { %7 = vsyncpa [#allocation5], 0  ;;  %s204_s0 = inlined_call_operand.hbm [shape: f32[10], index: 0, kind: input, shape index: {}]   ;;  %s205_s1 = inlined_call_operand.hbm [shape: f32[8,128], index: 1, kind: input, shape index: {}]   ;;  %s206_s2 = inlined_call_operand.hbm [shape: f32[8,128], index: 2, kind: output, shape index: {}]  }
   0x1   :  { %8 = vsyncpa [#allocation3], 0 }
   0x2   :  { %9 = vsyncpa [#allocation4], 0  ;;  %s15_s11 = sshll.u32 %s204_s0, 4  ;;  %s24_s14 = sshll.u32 %s205_s1, 4  ;;  %s16_s11 = int_to_ptr.hbm [resolvable:$true] %s15_s11  ;;  %s25_s14 = int_to_ptr.hbm [resolvable:$true] %s24_s14 }
   0x3   :  { %s177_s15 = smov [#allocation2]   ;;  %s178_s16 = smov [#allocation6]  }
   0x4   :  { %18 = dma.hbm_to_smem %s16_s11, 16, %s177_s15, [#allocation5]  }
   0x5   :  { %s26_s17 = sshll.u32 %s178_s16, 4  ;;  %s27_s17 = int_to_ptr.vmem [resolvable:$true] %s26_s17 }
   0x6   :  { %29 = dma.hbm_to_vmem [thread:$0]  %s25_s14, 128, %s27_s17, [#allocation3]  }
   0x7   :  { %171 = dma.done.wait [#allocation5], 16  }
   0x8   :  { %172 = vsyncadd [#allocation5], 4294967280 }
   0x9   :  { %173 = dma.done.wait [#allocation3], 128  }
   0xa   :  { %174 = vsyncadd [#allocation3], 4294967168 }
   0xb   :  { %38 = sfence }
   0xc   :  { %s40_s18 = sld [smem:[#allocation2]]  ;;  %v39_v0 = vld [vmem:[#allocation6] sm:$0xff]  ;;  %s179_s26 = smov [#allocation7]  }
   0xd   :  { %s97_s19 = sld [smem:[#allocation2 + $0x1]]  ;;  %s84_s27 = sshll.u32 %s179_s26, 4  ;;  %s85_s27 = int_to_ptr.vmem [resolvable:$true] %s84_s27 }
   0xe   :  { %s98_s0 = sld [smem:[#allocation2 + $0x2]]  ;;  %s86_s30 = sshll.u32 %s206_s2, 4  ;;  %s87_s30 = int_to_ptr.hbm [resolvable:$true] %s86_s30 }
   0xf   :  { %s99_s20 = sld [smem:[#allocation2 + $0x3]] }
  0x10   :  { %s100_s21 = sld [smem:[#allocation2 + $0x4]] }
  0x11   :  { %s101_s22 = sld [smem:[#allocation2 + $0x5]] }
  0x12   :  { %s102_s1 = sld [smem:[#allocation2 + $0x6]]  ;;  %v50_v1 = vstv %s40_s18 }
  0x13   :  { %s103_s23 = sld [smem:[#allocation2 + $0x7]]  ;;  %v51_v2 = vmul.f32 %v50_v1, %v39_v0  ;;  %v55_v3 = vstv %s97_s19 }
  0x14   :  { %s104_s24 = sld [smem:[#allocation2 + $0x8]]  ;;  %v56_v4 = vmul.f32 %v55_v3, %v39_v0  ;;  %v60_v5 = vstv %s98_s0 }
  0x15   :  { %v52_v6 = vstv %s99_s20  ;;  %v61_v7 = vmul.f32 %v60_v5, %v39_v0  ;;  %s105_s25 = sld [smem:[#allocation2 + $0x9]] }
  0x16   :  { %v53_v8 = vadd.f32 %v52_v6, %v51_v2  ;;  %v57_v9 = vstv %s100_s21 }
  0x17   :  { %v58_v10 = vadd.f32 %v57_v9, %v56_v4  ;;  %v62_v11 = vstv %s101_s22 }
  0x18   :  { %v54_v12 = vmax.f32 %v53_v8, 0.0  ;;  %v63_v13 = vadd.f32 %v62_v11, %v61_v7  ;;  %v65_v14 = vstv %s102_s1 }
  0x19   :  { %v59_v15 = vmax.f32 %v58_v10, 0.0  ;;  %v67_v16 = vstv %s103_s23 }
  0x1a   :  { %v64_v17 = vmax.f32 %v63_v13, 0.0  ;;  %v66_v18 = vmul.f32 %v65_v14, %v54_v12  ;;  %v70_v19 = vstv %s104_s24 }
  0x1b   :  { %v68_v20 = vmul.f32 %v67_v16, %v59_v15  ;;  %v73_v23 = vstv %s105_s25 }
  0x1c   :  { %v71_v21 = vmul.f32 %v70_v19, %v64_v17 }
  0x1d   :  { %v69_v22 = vadd.f32 %v68_v20, %v66_v18 }
  0x1f   :  { %v72_v24 = vadd.f32 %v71_v21, %v69_v22 }
  0x21   :  { %v74_v25 = vadd.f32 %v73_v23, %v72_v24 }
  0x23   :  { %109 = vtanh.f32 %v74_v25 }
  0x29   :  { %v110_v26 = vpop.eup %109 }
  0x2a   :  { %v76_v27 = vmul.f32 0.5, %v110_v26 }
  0x2c   :  { %v77_v28 = vadd.f32 0.5, %v76_v27 }
  0x2e   :  { %78 = vst [vmem:[#allocation7] sm:$0xff] %v77_v28 }
  0x2f   :  { %89 = dma.vmem_to_hbm [thread:$0]  %s85_s27, 128, %s87_s30, [#allocation4]  }
  0x30   :  { %175 = dma.done.wait [#allocation4], 128  }
  0x31   :  { %176 = vsyncadd [#allocation4], 4294967168 }
  0x32   :  { %94 = vsyncpa [#allocation3], 1 }
  0x33   :  { %95 = vsyncpa [#allocation4], 1 }
  0x34   :  { %96 = vsyncpa [#allocation5], 1 }

</bundles_post_ra>
